<compile_context>
chip_gen: v7x
topology: tpu7x:2x2x1
jax: 0.10.0
libtpu: 0.0.40
codegen_flags: <defaults>
</compile_context>

<pallas_src>
import jax
import jax.numpy as jnp
from jax.experimental import pallas as pl
from jax.experimental.pallas import tpu as pltpu


def _round_up(n, m):
    return ((n + m - 1) // m) * m


def mlp_kernel(x_ref, w1_ref, b1_ref, w2_ref, b2_ref, w3_ref, b3_ref, o_ref):
    # x_ref: (IN, TB) with batch on the lane axis.  Weights are stored (out, in)
    # (PyTorch layout), so y = W @ x is the same math as PyTorch's x @ W.T.
    x = x_ref[...]
    h1 = jnp.dot(w1_ref[...], x, preferred_element_type=jnp.float32,
                 precision=jax.lax.Precision.HIGHEST)
    h1 = jnp.maximum(h1 + b1_ref[...], 0.0)                      # (H1, TB)
    h2 = jnp.dot(w2_ref[...], h1, preferred_element_type=jnp.float32,
                 precision=jax.lax.Precision.HIGHEST)
    h2 = jnp.maximum(h2 + b2_ref[...], 0.0)                      # (H2, TB)
    # Output layer has a single unit: VPU multiply + sublane reduce instead of
    # a 1-row MXU matmul.  w3_ref is stored as (H2, 1).
    z = jnp.sum(w3_ref[...] * h2, axis=0, keepdims=True) + b3_ref[...]   # (1, TB)
    # Sigmoid via tanh: sigmoid(z) = 0.5*tanh(z/2) + 0.5 (exact identity).
    # tanh goes to the EUP, whose VLIW slot is otherwise empty here.
    o_ref[...] = (0.5 * jnp.tanh(0.5 * z) + 0.5).astype(o_ref.dtype)


def ann_forward(x, params, tile_batch=32768, x_is_transposed=False):
    """Forward pass of ANN_model.

    x: (batch, in_features)  -- or (in_features, batch) if x_is_transposed,
       which avoids the wrapper transpose pass entirely.
    Returns (batch, 1) float32.
    """
    w1, b1, w2, b2, w3, b3 = params
    in_features = w1.shape[1]
    h1_dim, h2_dim = w1.shape[0], w2.shape[0]
    assert w3.shape == (h2_dim, 1)

    if x_is_transposed:
        assert x.shape[0] == in_features
        batch = x.shape[1]
        x_t = x.astype(jnp.float32)
    else:
        batch, xin = x.shape
        assert xin == in_features
        x_t = x.astype(jnp.float32).T

    # Lane-dense batch tiling (multiple of 128).  Keep the tile large enough to
    # amortize the ~0.35 us per-grid-step overhead but small enough to fit the
    # v7x 64 MiB VMEM with double buffering.
    tile_batch = max(128, _round_up(min(tile_batch, 65536), 128))
    tb = min(tile_batch, _round_up(batch, 128))
    # Prefer >= 2 tiles so v7x's two TensorCores both get work on the
    # "parallel" grid axis (irrelevant on single-TC v5e/v6e).
    if _round_up(batch, tb) == tb and tb >= 256:
        tb = _round_up(pl.cdiv(tb, 2), 128)
    padded = _round_up(batch, tb)
    num_tiles = padded // tb

    # Only pad when there is a ragged tail (avoids an extra full HBM copy of x
    # for aligned batches).  Padded tail columns are zeros and are sliced off
    # before returning.
    if padded != batch:
        x_t = jnp.pad(x_t, ((0, 0), (0, padded - batch)))

    # Per-step VMEM footprint: double-buffered x tile + double-buffered output
    # tile + f32 intermediates + resident weights.  Give it ~1.5x headroom but
    # never below the 32 MiB default scoped limit.
    weight_bytes = sum(int(a.size) * 4 for a in (w1, b1, w2, b2, w3, b3))
    footprint = (2 * in_features * tb * 4 + 2 * tb * 4
                 + (h1_dim + h2_dim) * tb * 4 + weight_bytes)
    vmem_limit = max(32 * 1024 * 1024, int(footprint * 1.5) + (2 << 20))

    def resident(a):  # full-array block + constant index map -> stays in VMEM
        return pl.BlockSpec(a.shape, lambda i: (0, 0))

    out = pl.pallas_call(
        mlp_kernel,
        out_shape=jax.ShapeDtypeStruct((1, padded), jnp.float32),
        grid=(num_tiles,),
        in_specs=[
            pl.BlockSpec((in_features, tb), lambda i: (0, i)),   # stream x tiles
            resident(w1), resident(b1),
            resident(w2), resident(b2),
            resident(w3), resident(b3),
        ],
        out_specs=pl.BlockSpec((1, tb), lambda i: (0, i)),       # lane-dense store
        compiler_params=pltpu.CompilerParams(
            dimension_semantics=("parallel",),                    # megacore on v7x
            vmem_limit_bytes=vmem_limit),
    )(x_t, w1, b1, w2, b2, w3, b3)
    return out[0, :batch].reshape(batch, 1)


def init_params(key, input_features=8, hidden1=20, hidden2=10, out_features=1):
    assert out_features == 1, "kernel's reduce-based output layer assumes one unit"
    ks = jax.random.split(key, 6)

    def lin(kw, kb, fan_in, fan_out):
        # PyTorch nn.Linear default init: U(-1/sqrt(fan_in), 1/sqrt(fan_in)).
        bound = 1.0 / jnp.sqrt(jnp.float32(fan_in))
        w = jax.random.uniform(kw, (fan_out, fan_in), jnp.float32, -bound, bound)
        b = jax.random.uniform(kb, (fan_out, 1), jnp.float32, -bound, bound)
        return w, b

    w1, b1 = lin(ks[0], ks[1], input_features, hidden1)   # (H1, IN), (H1, 1)
    w2, b2 = lin(ks[2], ks[3], hidden1, hidden2)          # (H2, H1), (H2, 1)
    w3, b3 = lin(ks[4], ks[5], hidden2, out_features)     # (1, H2), (1, 1)
    # Store the output-layer weight as (H2, 1) so the kernel's sublane reduce
    # needs no in-kernel transpose.
    return (w1, b1, w2, b2, w3.T, b3)


def ann_ref(x, params):
    w1, b1, w2, b2, w3, b3 = params       # w1 (H1,IN), w2 (H2,H1), w3 (H2,1)
    h1 = jnp.maximum(x @ w1.T + b1.T, 0.0)
    h2 = jnp.maximum(h1 @ w2.T + b2.T, 0.0)
    return jax.nn.sigmoid(h2 @ w3 + b3.T)


if __name__ == "__main__":
    key = jax.random.PRNGKey(0)
    kx, kp = jax.random.split(key)
    batch, input_features = 8, 8
    x = jax.random.normal(kx, (batch, input_features), jnp.float32)
    params = init_params(kp, input_features=input_features,
                         hidden1=20, hidden2=10, out_features=1)

    out = jax.block_until_ready(ann_forward(x, params))

    ref = ann_ref(x, params)
    assert out.shape == (batch, 1)
    assert jnp.allclose(out, ref, atol=1e-5, rtol=1e-5)
    print("KERNEL_OK")
</pallas_src>

<mosaic_0001>
module attributes {stable_mosaic.version = 11 : i64} {
  func.func @mlp_kernel(%arg0: i32, %arg1: memref<8x128xf32, #tpu.memory_space<vmem>>, %arg2: memref<20x8xf32, #tpu.memory_space<vmem>>, %arg3: memref<20x1xf32, #tpu.memory_space<vmem>>, %arg4: memref<10x20xf32, #tpu.memory_space<vmem>>, %arg5: memref<10x1xf32, #tpu.memory_space<vmem>>, %arg6: memref<10x1xf32, #tpu.memory_space<vmem>>, %arg7: memref<1x1xf32, #tpu.memory_space<vmem>>, %arg8: memref<1x128xf32, #tpu.memory_space<vmem>>) attributes {dimension_semantics = [#tpu.dimension_semantics<parallel>], iteration_bounds = array<i64: 1>, scalar_prefetch = 0 : i64, scratch_operands = 0 : i64, tpu.core_type = #tpu.core_type<tc>, window_params = [{transform_indices = @transform_0, window_bounds = array<i64: 8, 128>}, {pipeline_mode = #tpu.pipeline_mode<synchronous>, transform_indices = @transform_1, window_bounds = array<i64: 20, 8>}, {pipeline_mode = #tpu.pipeline_mode<synchronous>, transform_indices = @transform_2, window_bounds = array<i64: 20, 1>}, {pipeline_mode = #tpu.pipeline_mode<synchronous>, transform_indices = @transform_3, window_bounds = array<i64: 10, 20>}, {pipeline_mode = #tpu.pipeline_mode<synchronous>, transform_indices = @transform_4, window_bounds = array<i64: 10, 1>}, {pipeline_mode = #tpu.pipeline_mode<synchronous>, transform_indices = @transform_5, window_bounds = array<i64: 10, 1>}, {pipeline_mode = #tpu.pipeline_mode<synchronous>, transform_indices = @transform_6, window_bounds = array<i64: 1, 1>}, {transform_indices = @transform_7, window_bounds = array<i64: 1, 128>}]} {
    %c0 = arith.constant 0 : index
    %c0_0 = arith.constant 0 : index
    %0 = vector.load %arg1[%c0, %c0_0] : memref<8x128xf32, #tpu.memory_space<vmem>>, vector<8x128xf32>
    %c0_1 = arith.constant 0 : index
    %c0_2 = arith.constant 0 : index
    %1 = vector.load %arg2[%c0_1, %c0_2] : memref<20x8xf32, #tpu.memory_space<vmem>>, vector<20x8xf32>
    %cst = arith.constant dense<0.000000e+00> : vector<20x128xf32>
    %2 = tpu.matmul %1, %0, %cst {dimension_numbers = #tpu.dot_dimension_numbers<[1], [0], [0], [1], [0, 0, 1, 1], [], []>, precision = #tpu.contract_precision<fp32>} : vector<20x8xf32>, vector<8x128xf32>, vector<20x128xf32> -> vector<20x128xf32>
    %c0_3 = arith.constant 0 : index
    %c0_4 = arith.constant 0 : index
    %3 = vector.load %arg3[%c0_3, %c0_4] : memref<20x1xf32, #tpu.memory_space<vmem>>, vector<20x1xf32>
    %4 = vector.broadcast %3 : vector<20x1xf32> to vector<20x128xf32>
    %5 = arith.addf %2, %4 : vector<20x128xf32>
    %cst_5 = arith.constant 0.000000e+00 : f32
    %6 = vector.broadcast %cst_5 : f32 to vector<20x128xf32>
    %7 = arith.maximumf %5, %6 : vector<20x128xf32>
    %c0_6 = arith.constant 0 : index
    %c0_7 = arith.constant 0 : index
    %8 = vector.load %arg4[%c0_6, %c0_7] : memref<10x20xf32, #tpu.memory_space<vmem>>, vector<10x20xf32>
    %cst_8 = arith.constant dense<0.000000e+00> : vector<10x128xf32>
    %9 = tpu.matmul %8, %7, %cst_8 {dimension_numbers = #tpu.dot_dimension_numbers<[1], [0], [0], [1], [0, 0, 1, 1], [], []>, precision = #tpu.contract_precision<fp32>} : vector<10x20xf32>, vector<20x128xf32>, vector<10x128xf32> -> vector<10x128xf32>
    %c0_9 = arith.constant 0 : index
    %c0_10 = arith.constant 0 : index
    %10 = vector.load %arg5[%c0_9, %c0_10] : memref<10x1xf32, #tpu.memory_space<vmem>>, vector<10x1xf32>
    %11 = vector.broadcast %10 : vector<10x1xf32> to vector<10x128xf32>
    %12 = arith.addf %9, %11 : vector<10x128xf32>
    %cst_11 = arith.constant 0.000000e+00 : f32
    %13 = vector.broadcast %cst_11 : f32 to vector<10x128xf32>
    %14 = arith.maximumf %12, %13 : vector<10x128xf32>
    %c0_12 = arith.constant 0 : index
    %c0_13 = arith.constant 0 : index
    %15 = vector.load %arg6[%c0_12, %c0_13] : memref<10x1xf32, #tpu.memory_space<vmem>>, vector<10x1xf32>
    %16 = vector.broadcast %15 : vector<10x1xf32> to vector<10x128xf32>
    %17 = arith.mulf %16, %14 : vector<10x128xf32>
    %cst_14 = arith.constant dense<0.000000e+00> : vector<128xf32>
    %18 = vector.multi_reduction <add>, %17, %cst_14 [0] : vector<10x128xf32> to vector<128xf32>
    %19 = vector.shape_cast %18 : vector<128xf32> to vector<1x128xf32>
    %c0_15 = arith.constant 0 : index
    %c0_16 = arith.constant 0 : index
    %20 = vector.load %arg7[%c0_15, %c0_16] : memref<1x1xf32, #tpu.memory_space<vmem>>, vector<1x1xf32>
    %21 = vector.broadcast %20 : vector<1x1xf32> to vector<1x128xf32>
    %22 = arith.addf %19, %21 : vector<1x128xf32>
    %cst_17 = arith.constant 5.000000e-01 : f32
    %23 = vector.broadcast %cst_17 : f32 to vector<1x128xf32>
    %24 = arith.mulf %23, %22 : vector<1x128xf32>
    %25 = math.tanh %24 : vector<1x128xf32>
    %cst_18 = arith.constant 5.000000e-01 : f32
    %26 = vector.broadcast %cst_18 : f32 to vector<1x128xf32>
    %27 = arith.mulf %26, %25 : vector<1x128xf32>
    %cst_19 = arith.constant 5.000000e-01 : f32
    %28 = vector.broadcast %cst_19 : f32 to vector<1x128xf32>
    %29 = arith.addf %27, %28 : vector<1x128xf32>
    %c0_20 = arith.constant 0 : index
    %c0_21 = arith.constant 0 : index
    %30 = vector.load %arg8[%c0_20, %c0_21] : memref<1x128xf32, #tpu.memory_space<vmem>>, vector<1x128xf32>
    tpu.vector_store %arg8[%c0_20, %c0_21], %29 {strides = array<i32>} : memref<1x128xf32, #tpu.memory_space<vmem>>, vector<1x128xf32>,
    return
  }
  func.func @transform_0(%arg0: i32) -> (i32, i32) {
    %c0_i32 = arith.constant 0 : i32
    %c0_i32_0 = arith.constant 0 : i32
    return %c0_i32, %arg0 : i32, i32
  }
  func.func @transform_1(%arg0: i32) -> (i32, i32) {
    %c0_i32 = arith.constant 0 : i32
    %c0_i32_0 = arith.constant 0 : i32
    %c0_i32_1 = arith.constant 0 : i32
    return %c0_i32, %c0_i32_0 : i32, i32
  }
  func.func @transform_2(%arg0: i32) -> (i32, i32) {
    %c0_i32 = arith.constant 0 : i32
    %c0_i32_0 = arith.constant 0 : i32
    %c0_i32_1 = arith.constant 0 : i32
    return %c0_i32, %c0_i32_0 : i32, i32
  }
  func.func @transform_3(%arg0: i32) -> (i32, i32) {
    %c0_i32 = arith.constant 0 : i32
    %c0_i32_0 = arith.constant 0 : i32
    %c0_i32_1 = arith.constant 0 : i32
    return %c0_i32, %c0_i32_0 : i32, i32
  }
  func.func @transform_4(%arg0: i32) -> (i32, i32) {
    %c0_i32 = arith.constant 0 : i32
    %c0_i32_0 = arith.constant 0 : i32
    %c0_i32_1 = arith.constant 0 : i32
    return %c0_i32, %c0_i32_0 : i32, i32
  }
  func.func @transform_5(%arg0: i32) -> (i32, i32) {
    %c0_i32 = arith.constant 0 : i32
    %c0_i32_0 = arith.constant 0 : i32
    %c0_i32_1 = arith.constant 0 : i32
    return %c0_i32, %c0_i32_0 : i32, i32
  }
  func.func @transform_6(%arg0: i32) -> (i32, i32) {
    %c0_i32 = arith.constant 0 : i32
    %c0_i32_0 = arith.constant 0 : i32
    %c0_i32_1 = arith.constant 0 : i32
    return %c0_i32, %c0_i32_0 : i32, i32
  }
  func.func @transform_7(%arg0: i32) -> (i32, i32) {
    %c0_i32 = arith.constant 0 : i32
    %c0_i32_0 = arith.constant 0 : i32
    return %c0_i32, %arg0 : i32, i32
  }
}

</mosaic_0001>

<bundles_post_ra>
// kernel: tpu_custom_call.1
= control target key start
LH: loop header
LB: loop body
LE: loop exit
PB: predicated region body
PF: predicated region fallthrough
CT: control target
= control target key end

     0   :  { %s1658_s0 = inlined_call_operand.vmem [shape: f32[8,128], index: 0, kind: input, shape index: {}]   ;;  %s1659_s1 = inlined_call_operand.vmem [shape: f32[20,8], index: 1, kind: input, shape index: {}]   ;;  %s1660_s2 = inlined_call_operand.vmem [shape: f32[20,1], index: 2, kind: input, shape index: {}]   ;;  %s1661_s3 = inlined_call_operand.vmem [shape: f32[10,20], index: 3, kind: input, shape index: {}]   ;;  %s1662_s4 = inlined_call_operand.vmem [shape: f32[10,1], index: 4, kind: input, shape index: {}]   ;;  %s1663_s5 = inlined_call_operand.vmem [shape: f32[10,1], index: 5, kind: input, shape index: {}]   ;;  %s1664_s6 = inlined_call_operand.<no memory space> [shape: f32[1,1], index: 6, kind: input, shape index: {}]   ;;  %s1665_s7 = inlined_call_operand.hbm [shape: f32[1,128], index: 7, kind: output, shape index: {}]  }
   0x1   :  { %v12_v0 = vstv %s1664_s6 }
   0x2   :  { %13 = vst [vmem:[#allocation2] sm:$0x1] %v12_v0 }
   0x3   :  { %v29_v1 = vld [vmem:[%s1658_s0] sm:$0xff]  ;;  %vm51_vm0 = vcmask 64512   ;;  %v31_v3 = vld [vmem:[%s1659_s1 + $0x8] sm:$0xff]  ;;  %v1465_v4 = vmov 0.0   ;;  %vm1466_vm1 = vmmov 0   ;;  %v1467_v14 = vmov 0  }
   0x4   :  { %v30_v2 = vld [vmem:[%s1659_s1] sm:$0xff]  ;;  %1256 = vmatprep.subr.mxu0 %v1465_v4  ;;  %v1522_v5 = vand.u32 4294901760, %v29_v1  ;;  %1258 = vmatprep.mubr.msk.f32.mxu0 %vm1466_vm1, %v1465_v4  ;;  %v56_v7 = vsel %vm51_vm0, %v31_v3, 0  ;;  %v32_v8 = vld [vmem:[%s1659_s1 + $0x10] sm:$0xf] }
   0x5   :  { %v53_v6 = vsel %vm51_vm0, %v30_v2, 0  ;;  %v1531_v10 = vand.u32 4294901760, %v56_v7  ;;  %v59_v11 = vsel %vm51_vm0, %v32_v8, 0  ;;  %1245 = vmatprep.subr.mxu1 %v1465_v4  ;;  %1247 = vmatprep.mubr.msk.f32.mxu1 %vm1466_vm1, %v1465_v4  ;;  %v33_v12 = vld [vmem:[%s1660_s2] sm:$0xff]  ;;  %v35_v15 = vld [vmem:[%s1660_s2 + $0x10] sm:$0xf] }
   0x6   :  { %v1529_v9 = vand.u32 4294901760, %v53_v6  ;;  %v1540_v13 = vsub.f32 %v29_v1, %v1522_v5  ;;  %1246 = vmatpush3.msra.mxu1 %v1522_v5  ;;  %1437 = vset.pattern.permute.xlu0 %v1467_v14  ;;  %v1548_v18 = vand.u32 4294901760, %v59_v11 }
   0x7   :  { %v138_v17 = vsub.f32 %v56_v7, %v1531_v10  ;;  %1389 = vmatprep.subr.mxu1 %v1465_v4  ;;  %38 = vperm.xlu0 %1437, %v33_v12  }
   0x8   :  { %v128_v16 = vsub.f32 %v53_v6, %v1529_v9 }
   0x9   :  { %14 = vsyncpa [#allocation4], 0  ;;  %v160_v19 = vand.u32 4294901760, %v1540_v13  ;;  %v34_v20 = vld [vmem:[%s1660_s2 + $0x8] sm:$0xff]  ;;  %1438 = vset.pattern.permute.xlu1 %v1467_v14  ;;  %v139_v22 = vand.u32 4294901760, %v138_v17  ;;  %v148_v25 = vsub.f32 %v59_v11, %v1548_v18  ;;  %v598_v31 = vld [vmem:[%s1662_s4] sm:$0xff] }
   0xa   :  { %v129_v21 = vand.u32 4294901760, %v128_v16  ;;  %48 = vperm.xlu1 %1438, %v35_v15   ;;  %v599_v24 = vld [vmem:[%s1662_s4 + $0x8] sm:$0x3]  ;;  %v1138_v35 = vld [vmem:[%s1663_s5] sm:$0xff]  ;;  %vm610_vm2 = vcmask 162816   ;;  %vm617_vm3 = vcmask 1043456  }
   0xb   :  { %v161_v23 = vsub.f32 %v1540_v13, %v160_v19  ;;  %43 = vperm.xlu0 %1437, %v34_v20   ;;  %v149_v29 = vand.u32 4294901760, %v148_v25  ;;  %v140_v30 = vsub.f32 %v138_v17, %v139_v22  ;;  %v1139_v32 = vld [vmem:[%s1663_s5 + $0x8] sm:$0x3]  ;;  %v1161_v37 = vld [vmem:[#allocation2] sm:$0x1]  ;;  %vm1152_vm4 = vcmask 1041408  }
   0xc   :  { %v130_v26 = vsub.f32 %v128_v16, %v129_v21  ;;  %v596_v38 = vld [vmem:[%s1661_s3] sm:$0xff]  ;;  %v597_v51 = vld [vmem:[%s1661_s3 + $0x8] sm:$0x3]  ;;  %s1468_s3 = smov [#allocation3]  }
   0xd   :  { %v162_v27 = vand.u32 4294901760, %v161_v23  ;;  %v141_v33 = vand.u32 4294901760, %v140_v30  ;;  %v150_v34 = vsub.f32 %v148_v25, %v149_v29  ;;  %v612_v39 = vsel %vm610_vm2, %v596_v38, 0  ;;  %s1183_s23 = sshll.u32 %s1468_s3, 4  ;;  %s1184_s23 = int_to_ptr.vmem [resolvable:$true] %s1183_s23 }
   0xe   :  { %v131_v28 = vand.u32 4294901760, %v130_v26  ;;  %607 = vperm.xlu1 %1438, %v599_v24   ;;  %v1621_v40 = vand.u32 4294901760, %v612_v39  ;;  %v615_v53 = vsel %vm610_vm2, %v597_v51, 0  ;;  %s1441_s24 = scalar_lea.vmem %s1184_s23, 16  ;;  %s1445_s25 = scalar_lea.vmem %s1184_s23, 32 }
   0xf   :  { %1257 = vmatpush3.msra.mxu0 %v162_v27  ;;  %602 = vperm.xlu0 %1437, %v598_v31   ;;  %v151_v36 = vand.u32 4294901760, %v150_v34  ;;  %v1634_v55 = vand.u32 4294901760, %v615_v53  ;;  %p1442_p0 = scmp.ne.s32.totalorder %s1184_s23, %s1441_s24  ;;  %p1446_p1 = scmp.lt.s32.totalorder %s1184_s23, %s1184_s23 }
  0x10   :  { %1259 = vmatmul.mubr.f32.vlgmr.msra.gmra.mrb[0].mxu0 %v1529_v9  ;;  %1267 = vmatprep.subr.mxu0 %v1465_v4  ;;  %v1624_v41 = vsub.f32 %v612_v39, %v1621_v40  ;;  %p1447_p2 = scmp.lt.s32.totalorder %s1445_s25, %s1441_s24 }
  0x11   :  { %1268 = vmatpush3.msra.mxu0 %v1540_v13  ;;  %1269 = vmatprep.mubr.msk.f32.mxu0 %vm1466_vm1, %v1465_v4  ;;  %v700_v62 = vsub.f32 %v615_v53, %v1634_v55 }
  0x12   :  { %1278 = vmatprep.subr.mxu0 %v1465_v4  ;;  %1248 = vmatmul.mubr.f32.vlgmr.msra.gmra.mrb[0].mxu1 %v131_v28  ;;  %v691_v42 = vand.u32 4294901760, %v1624_v41  ;;  %p1448_p3 = por %p1447_p2, %p1446_p1 }
  0x13   :  { %1250 = vmatprep.mubr.msk.f32.mxu1 %vm1466_vm1, %v1465_v4  ;;  %1390 = vmatpush3.msra.mxu1 %v162_v27  ;;  %v701_v7 = vand.u32 4294901760, %v700_v62 }
  0x14   :  { %1147 = vperm.xlu1 %1438, %v1139_v32   ;;  %1142 = vperm.xlu0 %1437, %v1138_v35   ;;  %v692_v43 = vsub.f32 %v1624_v41, %v691_v42  ;;  %p1449_p4 = pnand %p1448_p3, %p1442_p0 }
  0x16   :  { %1251 = vmatmul.mubr.f32.gmra.mrb[2].mxu1 %v141_v33  ;;  %v693_v44 = vand.u32 4294901760, %v692_v43 }
  0x17   :  { %1253 = vmatprep.mubr.msk.f32.mxu1 %vm1466_vm1, %v1465_v4 }
  0x18   :  { %1270 = vmatmul.mubr.f32.vlgmr.msra.gmra.mrb[0].mxu0 %v128_v16  ;;  %1164 = vperm.xlu1 %1438, %v1161_v37   ;;  %v702_v16 = vsub.f32 %v700_v62, %v701_v7 }
  0x19   :  { %1272 = vmatprep.mubr.msk.f32.mxu0 %vm1466_vm1, %v1465_v4  ;;  %1279 = vmatpush3.msra.mxu0 %v1522_v5 }
  0x1a   :  { %1289 = vmatprep.subr.mxu0 %v1465_v4  ;;  %1254 = vmatmul.mubr.f32.gmra.mrb[4].mxu1 %v151_v36 }
  0x1b   :  { %1261 = vmatprep.mubr.msk.f32.mxu1 %vm1466_vm1, %v1465_v4 }
  0x1c   :  { %1273 = vmatmul.mubr.f32.gmra.mrb[2].mxu0 %v138_v17 }
  0x1d   :  { %1275 = vmatprep.mubr.msk.f32.mxu0 %vm1466_vm1, %v1465_v4 }
  0x1e   :  { %1262 = vmatmul.mubr.f32.vlgmr.msra.gmra.mrb[2].mxu1 %v1531_v10 }
  0x1f   :  { %1264 = vmatprep.mubr.msk.f32.mxu1 %vm1466_vm1, %v1465_v4 }
  0x20   :  { %1276 = vmatmul.mubr.f32.gmra.mrb[4].mxu0 %v148_v25 }
  0x21   :  { %1280 = vmatprep.mubr.msk.f32.mxu0 %vm1466_vm1, %v1465_v4 }
  0x22   :  { %1265 = vmatmul.mubr.f32.gmra.mrb[4].mxu1 %v1548_v18 }
  0x23   :  { %1317 = vmatprep.mubr.f32.mxu1 %v693_v44 }
  0x24   :  { %1281 = vmatmul.mubr.f32.vlgmr.msra.gmra.mrb[0].mxu0 %v129_v21 }
  0x25   :  { %1283 = vmatprep.mubr.msk.f32.mxu0 %vm1466_vm1, %v1465_v4  ;;  %1290 = vmatpush3.msra.mxu0 %v160_v19 }
  0x26   :  { %1300 = vmatprep.subr.mxu0 %v1465_v4 }
  0x28   :  { %1284 = vmatmul.mubr.f32.gmra.mrb[2].mxu0 %v139_v22  ;;  %v703_v22 = vand.u32 4294901760, %v702_v16 }
  0x29   :  { %1286 = vmatprep.mubr.msk.f32.mxu0 %vm1466_vm1, %v1465_v4 }
  0x2c   :  { %1287 = vmatmul.mubr.f32.gmra.mrb[4].mxu0 %v149_v29 }
  0x2d   :  { %1291 = vmatprep.mubr.msk.f32.mxu0 %vm1466_vm1, %v1465_v4 }
  0x30   :  { %1292 = vmatmul.mubr.f32.vlgmr.msra.gmra.mrb[0].mxu0 %v1529_v9 }
  0x31   :  { %1294 = vmatprep.mubr.msk.f32.mxu0 %vm1466_vm1, %v1465_v4  ;;  %1301 = vmatpush3.msra.mxu0 %v1522_v5 }
  0x34   :  { %1295 = vmatmul.mubr.f32.gmra.mrb[2].mxu0 %v1531_v10 }
  0x35   :  { %1297 = vmatprep.mubr.msk.f32.mxu0 %vm1466_vm1, %v1465_v4 }
  0x38   :  { %1298 = vmatmul.mubr.f32.gmra.mrb[4].mxu0 %v1548_v18 }
  0x39   :  { %1302 = vmatprep.mubr.msk.f32.mxu0 %vm1466_vm1, %v1465_v4 }
  0x3c   :  { %1303 = vmatmul.mubr.f32.vlgmr.msra.gmra.mrb[0].mxu0 %v1529_v9 }
  0x3d   :  { %1305 = vmatprep.mubr.msk.f32.mxu0 %vm1466_vm1, %v1465_v4 }
  0x40   :  { %1306 = vmatmul.mubr.f32.gmra.mrb[2].mxu0 %v1531_v10 }
  0x41   :  { %1308 = vmatprep.mubr.msk.f32.mxu0 %vm1466_vm1, %v1465_v4 }
  0x44   :  { %1309 = vmatmul.mubr.f32.gmra.mrb[4].mxu0 %v1548_v18 }
  0x86   :  { %v39_v52 = vpop.permute.xlu0 %38 }
  0x89   :  { %v49_v3 = vpop.permute.xlu1 %48 }
  0x8a   :  { %v44_v59 = vpop.permute.xlu0 %43 }
  0x8d   :  { %v608_v32 = vpop.permute.xlu1 %607 }
  0x8e   :  { %v603_v33 = vpop.permute.xlu0 %602 }
  0x93   :  { %v1148_v39 = vpop.permute.xlu1 %1147 }
  0x97   :  { %v1165_v53 = vpop.permute.xlu1 %1164 }
  0xe5   :  { %v133_v45 = vpop.f32.mrb[0].mxu1 }
  0xe6   :  { %v1249_v46 = vpop.f32.mrb[1].mxu1  ;;  %v134_v54 = vadd.f32 %v133_v45, %v39_v52 }
  0xe7   :  { %v1167_v46 = vlaneseq }
  0xf1   :  { %v235_v47 = vpop.f32.mrb[2].mxu1 }
  0xf2   :  { %v1263_v48 = vpop.f32.mrb[3].mxu1  ;;  %v1393_v60 = vadd.f32 %v235_v47, %v44_v59 }
  0xf3   :  { %v1168_v48 = vshrl.u32 %v1167_v46, 7 }
  0xf5   :  { %v241_v49 = vpop.f32.mrb[4].mxu1  ;;  %v1169_v51 = vsub.s32 0, %v1168_v48 }
  0xf6   :  { %v1266_v50 = vpop.f32.mrb[5].mxu1  ;;  %v1395_v4 = vadd.f32 %v241_v49, %v49_v3 }
 0x10f   :  { %v577_v56 = vpop.f32.mrb[0].mxu0 }
 0x110   :  { %v1392_v57 = vadd.f32 %v577_v56, %v134_v54  ;;  %v1304_v58 = vpop.f32.mrb[1].mxu0 }
 0x112   :  { %v593_v61 = vmax.f32 %v1392_v57, 0.0 }
 0x113   :  { %v583_v63 = vpop.f32.mrb[2].mxu0 }
 0x114   :  { %v622_v0 = vand.u32 4294901760, %v593_v61  ;;  %v1394_v1 = vadd.f32 %v1393_v60, %v583_v63  ;;  %v1307_v2 = vpop.f32.mrb[3].mxu0 }
 0x116   :  { %v711_v5 = vsub.f32 %v593_v61, %v622_v0  ;;  %v594_v6 = vmax.f32 %v1394_v1, 0.0 }
 0x117   :  { %v589_v8 = vpop.f32.mrb[4].mxu0 }
 0x118   :  { %v712_v9 = vand.u32 4294901760, %v711_v5  ;;  %v625_v10 = vand.u32 4294901760, %v594_v6  ;;  %v1396_v11 = vadd.f32 %v1395_v4, %v589_v8  ;;  %v1310_v12 = vpop.f32.mrb[5].mxu0 }
 0x11a   :  { %v1365_v13 = vpack.c.bf16 %v625_v10, %v622_v0  ;;  %v718_v14 = vsub.f32 %v594_v6, %v625_v10  ;;  %v595_v15 = vmax.f32 %v1396_v11, 0.0  ;;  %v713_v19 = vsub.f32 %v711_v5, %v712_v9 }
 0x11c   :  { %v719_v17 = vand.u32 4294901760, %v718_v14  ;;  %v619_v18 = vsel %vm617_vm3, %v595_v15, 0  ;;  %1366 = vmatprep.subr.bf16.mxu1 %v1365_v13  ;;  %v1373_v20 = vpack.c.bf16 %v718_v14, %v711_v5  ;;  %v714_v26 = vand.u32 4294901760, %v713_v19 }
 0x11d   :  { %v628_v21 = vand.u32 4294901760, %v619_v18  ;;  %1368 = vmatpush3.bf16.msra.mxu1 %v1365_v13 }
 0x11e   :  { %v720_v23 = vsub.f32 %v718_v14, %v719_v17  ;;  %v1381_v24 = vpack.c.bf16 %v719_v17, %v712_v9 }
 0x11f   :  { %v725_v25 = vsub.f32 %v619_v18, %v628_v21  ;;  %1315 = vmatprep.subr.mxu1 %v628_v21 }
 0x120   :  { %v721_v27 = vand.u32 4294901760, %v720_v23 }
 0x121   :  { %1316 = vmatpush3.msra.mxu1 %v628_v21  ;;  %v726_v28 = vand.u32 4294901760, %v725_v25 }
 0x122   :  { %1318 = vmatmul.mubr.f32.vlgmr.msra.gmra.mrb[6].mxu1 %v703_v22  ;;  %v1369_v29 = vpack.c.bf16 %v721_v27, %v714_v26 }
 0x123   :  { %v727_v30 = vsub.f32 %v725_v25, %v726_v28  ;;  %1326 = vmatprep.mubr.f32.mxu1 %v1621_v40 }
 0x124   :  { %1370 = vmatprep.subr.bf16.mxu1 %v1369_v29 }
 0x125   :  { %1372 = vmatpush3.bf16.msra.mxu1 %v1369_v29  ;;  %v728_v31 = vand.u32 4294901760, %v727_v30 }
 0x127   :  { %1324 = vmatprep.subr.mxu1 %v728_v31 }
 0x129   :  { %1325 = vmatpush3.msra.mxu1 %v728_v31 }
 0x12a   :  { %1327 = vmatmul.mubr.f32.vlgmr.msra.gmra.mrb[6].mxu1 %v1634_v55  ;;  %1374 = vmatprep.subr.bf16.mxu1 %v1373_v20 }
 0x12b   :  { %1376 = vmatpush3.bf16.msra.mxu1 %v1373_v20  ;;  %1335 = vmatprep.mubr.f32.mxu1 %v1624_v41 }
 0x12c   :  { %1333 = vmatprep.subr.mxu1 %v725_v25 }
 0x12f   :  { %1334 = vmatpush3.msra.mxu1 %v725_v25 }
 0x130   :  { %1378 = vmatprep.subr.bf16.mxu1 %v1365_v13 }
 0x132   :  { %1336 = vmatmul.mubr.f32.vlgmr.msra.gmra.mrb[6].mxu1 %v700_v62 }
 0x133   :  { %1380 = vmatpush3.bf16.msra.mxu1 %v1365_v13  ;;  %1344 = vmatprep.mubr.f32.mxu1 %v691_v42  ;;  %v1143_v42 = vpop.permute.xlu0 %1142 }
 0x134   :  { %1342 = vmatprep.subr.mxu1 %v628_v21 }
 0x137   :  { %1343 = vmatpush3.msra.mxu1 %v628_v21 }
 0x138   :  { %1382 = vmatprep.subr.bf16.mxu1 %v1381_v24 }
 0x13a   :  { %1345 = vmatmul.mubr.f32.vlgmr.msra.gmra.mrb[6].mxu1 %v701_v7 }
 0x13b   :  { %1384 = vmatpush3.bf16.msra.mxu1 %v1381_v24  ;;  %1353 = vmatprep.mubr.f32.mxu1 %v1621_v40 }
 0x13c   :  { %1351 = vmatprep.subr.mxu1 %v726_v28 }
 0x13f   :  { %1352 = vmatpush3.msra.mxu1 %v726_v28 }
 0x140   :  { %1386 = vmatprep.subr.bf16.mxu1 %v1365_v13 }
 0x142   :  { %1354 = vmatmul.mubr.f32.vlgmr.msra.gmra.mrb[6].mxu1 %v1634_v55 }
 0x143   :  { %1388 = vmatpush3.bf16.msra.mxu1 %v1365_v13  ;;  %1362 = vmatprep.mubr.f32.mxu1 %v1621_v40 }
 0x144   :  { %1360 = vmatprep.subr.mxu1 %v628_v21 }
 0x147   :  { %1361 = vmatpush3.msra.mxu1 %v628_v21 }
 0x14a   :  { %1363 = vmatmul.mubr.f32.vlgmr.msra.gmra.mrb[6].mxu1 %v1634_v55  ;;  %v1170_v55 = vrot.slane %v1165_v53, %v1169_v51 }
 0x21d   :  { %v1364_v34 = vpop.f32.mrb[6].mxu1 }
 0x21e   :  { %v1397_v35 = vadd.f32 %v1364_v34, %v608_v32  ;;  %v1126_v36 = vpop.f32.mrb[7].mxu1 }
 0x21f   :  { %v1398_v37 = vadd.f32 %v1126_v36, %v603_v33 }
 0x220   :  { %v1137_v38 = vmax.f32 %v1397_v35, 0.0 }
 0x221   :  { %v1136_v41 = vmax.f32 %v1398_v37, 0.0 }
 0x222   :  { %v1151_v43 = vmul.f32 %v1148_v39, %v1137_v38 }
 0x223   :  { %v1150_v44 = vmul.f32 %v1143_v42, %v1136_v41 }
 0x224   :  { %v1153_v45 = vsel %vm1152_vm4, %v1151_v43, 0.0 }
 0x225   :  { %v1154_v40 = vadd.f32 %v1153_v45, %v1150_v44 }
 0x227   :  { %v1155_v47 = vrot.slane %v1154_v40, 4 }
 0x229   :  { %v1156_v49 = vadd.f32 %v1155_v47, %v1154_v40 }
 0x22b   :  { %v1157_v50 = vrot.slane %v1156_v49, 2 }
 0x22d   :  { %v1158_v52 = vadd.f32 %v1157_v50, %v1156_v49 }
 0x22f   :  { %v1159_v54 = vrot.slane %v1158_v52, 1 }
 0x231   :  { %v1160_v56 = vadd.f32 %v1159_v54, %v1158_v52 }
 0x233   :  { %v1171_v57 = vadd.f32 %v1170_v55, %v1160_v56 }
 0x235   :  { %v1172_v58 = vmul.f32 0.5, %v1171_v57 }
 0x237   :  { %1439 = vtanh.f32 %v1172_v58 }
 0x241   :  { %v1440_v59 = vpop.eup %1439 }
 0x242   :  { %v1174_v60 = vmul.f32 0.5, %v1440_v59 }
 0x244   :  { %v1175_v61 = vadd.f32 0.5, %v1174_v60 }
 0x246   :  { %1176 = vst [vmem:[#allocation3] sm:$0x1] %v1175_v61 }
 0x247   :  { %1452 = shalt.err (!%p1449_p4)
}
 0x248   :  { %s1453_s28 = scalar_lea.hbm %s1665_s7, 16 }
 0x249   :  { %p1454_p5 = scmp.ne.s32.totalorder %s1665_s7, %s1453_s28  ;;  %p1457_p6 = scmp.lt.u32.totalorder %s1453_s28, %s1665_s7 }
 0x24b   :  { %p1459_p7 = pnand %p1457_p6, %p1454_p5 }
 0x24d   :  { %1462 = shalt.err (!%p1459_p7)
}
 0x24e   :  { %1186 = dma.vmem_to_hbm [thread:$0]  %s1184_s23, 16, %s1665_s7, [#allocation4]  }
 0x24f   :  { %1463 = dma.done.wait [#allocation4], 16  }
 0x250   :  { %1464 = vsyncadd [#allocation4], 4294967280 }
 0x251   :  { %1190 = vsyncpa [#allocation4], 1 }

</bundles_post_ra>
